<compile_context>
chip_gen: v7x
topology: tpu7x:2x2x1
jax: 0.10.0
libtpu: 0.0.40
codegen_flags: <defaults>
</compile_context>

<pallas_src>
import functools

import jax
import jax.numpy as jnp
from jax.experimental import pallas as pl
from jax.experimental.pallas import tpu as pltpu


def _round_up(x: int, m: int) -> int:
    return ((x + m - 1) // m) * m


def _sparse_attn_kernel(x_ref, o_ref, *, top_k: int):
    """One (bm, T) block: sparse top-k re-normalized attention.

    Per row:
      delta = (top_k-th largest value, counting duplicates) + eps
      w     = max(x - delta, 0)
      out   = w / (sum(w) + eps)
    """
    eps = jnp.float32(1e-7)
    neg_inf = jnp.float32(-jnp.inf)

    # Single live f32 working copy; the input block stays resident in VMEM and
    # is re-read after the threshold search (no second full-block temp).
    work = x_ref[...].astype(jnp.float32)                    # (bm, T)
    bm = work.shape[0]
    kf = jnp.float32(top_k)

    removed = jnp.zeros((bm, 1), jnp.float32)
    kth = jnp.zeros((bm, 1), jnp.float32)
    found = jnp.zeros((bm, 1), jnp.bool_)

    # O(k*T) k-th largest (counting duplicates) via iterative max-and-mask.
    # Tie counts accumulate in f32 (exact for T < 2**24), so duplicate values
    # get the same threshold as torch.topk / lax.top_k.
    for _ in range(top_k - 1):                               # first k-1 levels
        cur_max = jnp.max(work, axis=1, keepdims=True)       # XLU lane reduce
        is_max = work >= cur_max
        ties = jnp.sum(is_max.astype(jnp.float32), axis=1, keepdims=True)
        hit = jnp.logical_and(jnp.logical_not(found), removed + ties >= kf)
        kth = jnp.where(hit, cur_max, kth)
        found = jnp.logical_or(found, hit)
        removed = removed + ties
        work = jnp.where(is_max, neg_inf, work)              # drop this level

    # Last level: if the threshold was not hit within the first k-1 distinct
    # levels, fewer than k elements were removed, so this level's max IS the
    # k-th largest.  Skips one XLU tie-count reduce and one full-block select.
    cur_max = jnp.max(work, axis=1, keepdims=True)
    kth = jnp.where(found, kth, cur_max)

    delta = kth + eps
    x = x_ref[...].astype(jnp.float32)                       # re-read resident block
    w = jnp.maximum(x - delta, 0.0)
    s = jnp.sum(w, axis=1, keepdims=True) + eps
    # EUP reciprocal on the (bm, 1) row sums + one Newton-Raphson refinement
    # (restores full f32 accuracy); the per-element op is a cheap VPU multiply.
    inv = pl.reciprocal(s, approx=True)
    inv = inv * (2.0 - s * inv)
    o_ref[...] = (w * inv).astype(o_ref.dtype)


def sparse_attention(attn_s: jax.Array, top_k: int = 5) -> jax.Array:
    """JAX/Pallas equivalent of Sparse_attention(top_k).forward(attn_s)."""
    k = top_k + 1                        # the module does top_k += 1 in __init__
    B, T = attn_s.shape
    if T <= k:                           # same early exit as the PyTorch module
        return attn_s

    itemsize = jnp.dtype(attn_s.dtype).itemsize
    # Sublane packing floor: 8 rows for 4-byte, 16 for 2-byte, 32 for 1-byte.
    sub_min = max(8, 32 // max(itemsize, 1))
    Tp = _round_up(T, 128)               # physical lane footprint per row

    # VMEM budget: 2 in + 2 out pipeline buffers (input dtype) plus ~2 live
    # full-block f32 temporaries inside the kernel.  Target ~12 MiB so the
    # default scoped limit is respected on every generation (v5e: 16 MiB,
    # v6e/v7x: 32 MiB) with headroom for compiler temporaries.
    per_row = (4 * itemsize + 2 * 4) * Tp
    bm_max = max(sub_min, ((12 << 20) // per_row) // sub_min * sub_min)

    if B <= sub_min:
        bm = B                           # full (unpadded) batch dim, one block
    else:
        # Cap the tile so the grid has >= 2 steps: the "parallel" axis then
        # shards across both TensorCores on v7x; on 1-TC chips the extra grid
        # step costs only ~0.35 us.
        bm = min(bm_max, _round_up(-(-B // 2), sub_min))

    kernel = functools.partial(_sparse_attn_kernel, top_k=k)

    # No host-side padding or slicing: batch uses a cdiv grid (partial last
    # block is masked on writeback), lanes use the full unpadded T.
    return pl.pallas_call(
        kernel,
        out_shape=jax.ShapeDtypeStruct((B, T), attn_s.dtype),
        grid=(pl.cdiv(B, bm),),
        in_specs=[pl.BlockSpec((bm, T), lambda i: (i, 0))],
        out_specs=pl.BlockSpec((bm, T), lambda i: (i, 0)),
        compiler_params=pltpu.CompilerParams(
            dimension_semantics=("parallel",),
            vmem_limit_bytes=32 << 20,   # <= physical on all gens (v7x: 64 MiB)
        ),
    )(attn_s)


def _reference(attn_s, top_k=5):
    """Pure-JAX reference mirroring the PyTorch forward."""
    k = top_k + 1
    eps = 1e-7
    T = attn_s.shape[1]
    if T <= k:
        return attn_s
    vals = jax.lax.top_k(attn_s, k)[0]
    delta = vals[:, -1:] + eps
    w = jnp.maximum(attn_s - delta, 0.0)
    s = jnp.sum(w, axis=1, keepdims=True) + eps
    return w / s


if __name__ == "__main__":
    key = jax.random.PRNGKey(0)
    B, T = 16, 200                       # attn_s: (BATCHSIZE, K); unaligned T
    logits = jax.random.normal(key, (B, T), dtype=jnp.float32)
    attn_s = jax.nn.softmax(logits, axis=-1)

    out = jax.block_until_ready(sparse_attention(attn_s, top_k=5))
    ref = _reference(attn_s, top_k=5)
    assert out.shape == attn_s.shape
    assert out.dtype == attn_s.dtype
    assert jnp.allclose(out, ref, atol=1e-5, rtol=1e-5), "mismatch vs reference"

    # Tie-heavy input: duplicates at the k-th boundary must keep the same
    # threshold value as lax.top_k / torch.topk.
    q = jnp.floor(logits * 2.0) / 2.0
    out2 = jax.block_until_ready(sparse_attention(q, top_k=5))
    ref2 = _reference(q, top_k=5)
    assert jnp.allclose(out2, ref2, atol=1e-5, rtol=1e-5), "tie-case mismatch"

    # Uneven batch (partial last grid block on the row axis).
    r = jax.nn.softmax(jax.random.normal(jax.random.PRNGKey(1), (13, T)), axis=-1)
    out3 = jax.block_until_ready(sparse_attention(r, top_k=5))
    ref3 = _reference(r, top_k=5)
    assert jnp.allclose(out3, ref3, atol=1e-5, rtol=1e-5), "partial-block mismatch"

    print("KERNEL_OK")
</pallas_src>

<mosaic_0001>
module attributes {stable_mosaic.version = 11 : i64} {
  func.func @_sparse_attn_kernel(%arg0: i32, %arg1: memref<8x200xf32, #tpu.memory_space<vmem>>, %arg2: memref<8x200xf32, #tpu.memory_space<vmem>>) attributes {dimension_semantics = [#tpu.dimension_semantics<parallel>], iteration_bounds = array<i64: 2>, scalar_prefetch = 0 : i64, scratch_operands = 0 : i64, tpu.core_type = #tpu.core_type<tc>, window_params = [{transform_indices = @transform_0, window_bounds = array<i64: 8, 200>}, {transform_indices = @transform_1, window_bounds = array<i64: 8, 200>}]} {
    %c0 = arith.constant 0 : index
    %c0_0 = arith.constant 0 : index
    %0 = vector.load %arg1[%c0, %c0_0] : memref<8x200xf32, #tpu.memory_space<vmem>>, vector<8x200xf32>
    %cst = arith.constant 0.000000e+00 : f32
    %1 = vector.broadcast %cst : f32 to vector<8x1xf32>
    %cst_1 = arith.constant 0.000000e+00 : f32
    %2 = vector.broadcast %cst_1 : f32 to vector<8x1xf32>
    %false = arith.constant false
    %3 = vector.broadcast %false : i1 to vector<8x1xi1>
    %cst_2 = arith.constant dense<0xFF800000> : vector<8xf32>
    %4 = vector.multi_reduction <maximumf>, %0, %cst_2 [1] : vector<8x200xf32> to vector<8xf32>
    %5 = vector.shape_cast %4 : vector<8xf32> to vector<8x1xf32>
    %6 = vector.broadcast %5 : vector<8x1xf32> to vector<8x200xf32>
    %7 = arith.cmpf oge, %0, %6 : vector<8x200xf32>
    %8 = arith.extui %7 : vector<8x200xi1> to vector<8x200xi32>
    %9 = arith.sitofp %8 : vector<8x200xi32> to vector<8x200xf32>
    %cst_3 = arith.constant dense<0.000000e+00> : vector<8xf32>
    %10 = vector.multi_reduction <add>, %9, %cst_3 [1] : vector<8x200xf32> to vector<8xf32>
    %11 = vector.shape_cast %10 : vector<8xf32> to vector<8x1xf32>
    %cst_4 = arith.constant dense<true> : vector<8x1xi1>
    %12 = arith.xori %3, %cst_4 : vector<8x1xi1>
    %13 = arith.addf %1, %11 : vector<8x1xf32>
    %cst_5 = arith.constant 6.000000e+00 : f32
    %14 = vector.broadcast %cst_5 : f32 to vector<8x1xf32>
    %15 = arith.cmpf oge, %13, %14 : vector<8x1xf32>
    %16 = arith.andi %12, %15 : vector<8x1xi1>
    %17 = arith.select %16, %5, %2 : vector<8x1xi1>, vector<8x1xf32>
    %18 = arith.ori %3, %16 : vector<8x1xi1>
    %19 = arith.addf %1, %11 : vector<8x1xf32>
    %cst_6 = arith.constant 0xFF800000 : f32
    %20 = vector.broadcast %cst_6 : f32 to vector<8x200xf32>
    %21 = arith.select %7, %20, %0 : vector<8x200xi1>, vector<8x200xf32>
    %cst_7 = arith.constant dense<0xFF800000> : vector<8xf32>
    %22 = vector.multi_reduction <maximumf>, %21, %cst_7 [1] : vector<8x200xf32> to vector<8xf32>
    %23 = vector.shape_cast %22 : vector<8xf32> to vector<8x1xf32>
    %24 = vector.broadcast %23 : vector<8x1xf32> to vector<8x200xf32>
    %25 = arith.cmpf oge, %21, %24 : vector<8x200xf32>
    %26 = arith.extui %25 : vector<8x200xi1> to vector<8x200xi32>
    %27 = arith.sitofp %26 : vector<8x200xi32> to vector<8x200xf32>
    %cst_8 = arith.constant dense<0.000000e+00> : vector<8xf32>
    %28 = vector.multi_reduction <add>, %27, %cst_8 [1] : vector<8x200xf32> to vector<8xf32>
    %29 = vector.shape_cast %28 : vector<8xf32> to vector<8x1xf32>
    %cst_9 = arith.constant dense<true> : vector<8x1xi1>
    %30 = arith.xori %18, %cst_9 : vector<8x1xi1>
    %31 = arith.addf %19, %29 : vector<8x1xf32>
    %cst_10 = arith.constant 6.000000e+00 : f32
    %32 = vector.broadcast %cst_10 : f32 to vector<8x1xf32>
    %33 = arith.cmpf oge, %31, %32 : vector<8x1xf32>
    %34 = arith.andi %30, %33 : vector<8x1xi1>
    %35 = arith.select %34, %23, %17 : vector<8x1xi1>, vector<8x1xf32>
    %36 = arith.ori %18, %34 : vector<8x1xi1>
    %37 = arith.addf %19, %29 : vector<8x1xf32>
    %cst_11 = arith.constant 0xFF800000 : f32
    %38 = vector.broadcast %cst_11 : f32 to vector<8x200xf32>
    %39 = arith.select %25, %38, %21 : vector<8x200xi1>, vector<8x200xf32>
    %cst_12 = arith.constant dense<0xFF800000> : vector<8xf32>
    %40 = vector.multi_reduction <maximumf>, %39, %cst_12 [1] : vector<8x200xf32> to vector<8xf32>
    %41 = vector.shape_cast %40 : vector<8xf32> to vector<8x1xf32>
    %42 = vector.broadcast %41 : vector<8x1xf32> to vector<8x200xf32>
    %43 = arith.cmpf oge, %39, %42 : vector<8x200xf32>
    %44 = arith.extui %43 : vector<8x200xi1> to vector<8x200xi32>
    %45 = arith.sitofp %44 : vector<8x200xi32> to vector<8x200xf32>
    %cst_13 = arith.constant dense<0.000000e+00> : vector<8xf32>
    %46 = vector.multi_reduction <add>, %45, %cst_13 [1] : vector<8x200xf32> to vector<8xf32>
    %47 = vector.shape_cast %46 : vector<8xf32> to vector<8x1xf32>
    %cst_14 = arith.constant dense<true> : vector<8x1xi1>
    %48 = arith.xori %36, %cst_14 : vector<8x1xi1>
    %49 = arith.addf %37, %47 : vector<8x1xf32>
    %cst_15 = arith.constant 6.000000e+00 : f32
    %50 = vector.broadcast %cst_15 : f32 to vector<8x1xf32>
    %51 = arith.cmpf oge, %49, %50 : vector<8x1xf32>
    %52 = arith.andi %48, %51 : vector<8x1xi1>
    %53 = arith.select %52, %41, %35 : vector<8x1xi1>, vector<8x1xf32>
    %54 = arith.ori %36, %52 : vector<8x1xi1>
    %55 = arith.addf %37, %47 : vector<8x1xf32>
    %cst_16 = arith.constant 0xFF800000 : f32
    %56 = vector.broadcast %cst_16 : f32 to vector<8x200xf32>
    %57 = arith.select %43, %56, %39 : vector<8x200xi1>, vector<8x200xf32>
    %cst_17 = arith.constant dense<0xFF800000> : vector<8xf32>
    %58 = vector.multi_reduction <maximumf>, %57, %cst_17 [1] : vector<8x200xf32> to vector<8xf32>
    %59 = vector.shape_cast %58 : vector<8xf32> to vector<8x1xf32>
    %60 = vector.broadcast %59 : vector<8x1xf32> to vector<8x200xf32>
    %61 = arith.cmpf oge, %57, %60 : vector<8x200xf32>
    %62 = arith.extui %61 : vector<8x200xi1> to vector<8x200xi32>
    %63 = arith.sitofp %62 : vector<8x200xi32> to vector<8x200xf32>
    %cst_18 = arith.constant dense<0.000000e+00> : vector<8xf32>
    %64 = vector.multi_reduction <add>, %63, %cst_18 [1] : vector<8x200xf32> to vector<8xf32>
    %65 = vector.shape_cast %64 : vector<8xf32> to vector<8x1xf32>
    %cst_19 = arith.constant dense<true> : vector<8x1xi1>
    %66 = arith.xori %54, %cst_19 : vector<8x1xi1>
    %67 = arith.addf %55, %65 : vector<8x1xf32>
    %cst_20 = arith.constant 6.000000e+00 : f32
    %68 = vector.broadcast %cst_20 : f32 to vector<8x1xf32>
    %69 = arith.cmpf oge, %67, %68 : vector<8x1xf32>
    %70 = arith.andi %66, %69 : vector<8x1xi1>
    %71 = arith.select %70, %59, %53 : vector<8x1xi1>, vector<8x1xf32>
    %72 = arith.ori %54, %70 : vector<8x1xi1>
    %73 = arith.addf %55, %65 : vector<8x1xf32>
    %cst_21 = arith.constant 0xFF800000 : f32
    %74 = vector.broadcast %cst_21 : f32 to vector<8x200xf32>
    %75 = arith.select %61, %74, %57 : vector<8x200xi1>, vector<8x200xf32>
    %cst_22 = arith.constant dense<0xFF800000> : vector<8xf32>
    %76 = vector.multi_reduction <maximumf>, %75, %cst_22 [1] : vector<8x200xf32> to vector<8xf32>
    %77 = vector.shape_cast %76 : vector<8xf32> to vector<8x1xf32>
    %78 = vector.broadcast %77 : vector<8x1xf32> to vector<8x200xf32>
    %79 = arith.cmpf oge, %75, %78 : vector<8x200xf32>
    %80 = arith.extui %79 : vector<8x200xi1> to vector<8x200xi32>
    %81 = arith.sitofp %80 : vector<8x200xi32> to vector<8x200xf32>
    %cst_23 = arith.constant dense<0.000000e+00> : vector<8xf32>
    %82 = vector.multi_reduction <add>, %81, %cst_23 [1] : vector<8x200xf32> to vector<8xf32>
    %83 = vector.shape_cast %82 : vector<8xf32> to vector<8x1xf32>
    %cst_24 = arith.constant dense<true> : vector<8x1xi1>
    %84 = arith.xori %72, %cst_24 : vector<8x1xi1>
    %85 = arith.addf %73, %83 : vector<8x1xf32>
    %cst_25 = arith.constant 6.000000e+00 : f32
    %86 = vector.broadcast %cst_25 : f32 to vector<8x1xf32>
    %87 = arith.cmpf oge, %85, %86 : vector<8x1xf32>
    %88 = arith.andi %84, %87 : vector<8x1xi1>
    %89 = arith.select %88, %77, %71 : vector<8x1xi1>, vector<8x1xf32>
    %90 = arith.ori %72, %88 : vector<8x1xi1>
    %cst_26 = arith.constant 0xFF800000 : f32
    %91 = vector.broadcast %cst_26 : f32 to vector<8x200xf32>
    %92 = arith.select %79, %91, %75 : vector<8x200xi1>, vector<8x200xf32>
    %cst_27 = arith.constant dense<0xFF800000> : vector<8xf32>
    %93 = vector.multi_reduction <maximumf>, %92, %cst_27 [1] : vector<8x200xf32> to vector<8xf32>
    %94 = vector.shape_cast %93 : vector<8xf32> to vector<8x1xf32>
    %95 = arith.select %90, %89, %94 : vector<8x1xi1>, vector<8x1xf32>
    %cst_28 = arith.constant 1.000000e-07 : f32
    %96 = vector.broadcast %cst_28 : f32 to vector<8x1xf32>
    %97 = arith.addf %95, %96 : vector<8x1xf32>
    %c0_29 = arith.constant 0 : index
    %c0_30 = arith.constant 0 : index
    %98 = vector.load %arg1[%c0_29, %c0_30] : memref<8x200xf32, #tpu.memory_space<vmem>>, vector<8x200xf32>
    %99 = vector.broadcast %97 : vector<8x1xf32> to vector<8x200xf32>
    %100 = arith.subf %98, %99 : vector<8x200xf32>
    %cst_31 = arith.constant 0.000000e+00 : f32
    %101 = vector.broadcast %cst_31 : f32 to vector<8x200xf32>
    %102 = arith.maximumf %100, %101 : vector<8x200xf32>
    %cst_32 = arith.constant dense<0.000000e+00> : vector<8xf32>
    %103 = vector.multi_reduction <add>, %102, %cst_32 [1] : vector<8x200xf32> to vector<8xf32>
    %104 = vector.shape_cast %103 : vector<8xf32> to vector<8x1xf32>
    %cst_33 = arith.constant 1.000000e-07 : f32
    %105 = vector.broadcast %cst_33 : f32 to vector<8x1xf32>
    %106 = arith.addf %104, %105 : vector<8x1xf32>
    %107 = tpu.reciprocal %106 {approx = true} : vector<8x1xf32> -> vector<8x1xf32>
    %108 = arith.mulf %106, %107 : vector<8x1xf32>
    %cst_34 = arith.constant 2.000000e+00 : f32
    %109 = vector.broadcast %cst_34 : f32 to vector<8x1xf32>
    %110 = arith.subf %109, %108 : vector<8x1xf32>
    %111 = arith.mulf %107, %110 : vector<8x1xf32>
    %112 = vector.broadcast %111 : vector<8x1xf32> to vector<8x200xf32>
    %113 = arith.mulf %102, %112 : vector<8x200xf32>
    %c0_35 = arith.constant 0 : index
    %c0_36 = arith.constant 0 : index
    %114 = vector.load %arg2[%c0_35, %c0_36] : memref<8x200xf32, #tpu.memory_space<vmem>>, vector<8x200xf32>
    tpu.vector_store %arg2[%c0_35, %c0_36], %113 {strides = array<i32>} : memref<8x200xf32, #tpu.memory_space<vmem>>, vector<8x200xf32>,
    return
  }
  func.func @transform_0(%arg0: i32) -> (i32, i32) {
    %c0_i32 = arith.constant 0 : i32
    %c0_i32_0 = arith.constant 0 : i32
    return %arg0, %c0_i32 : i32, i32
  }
  func.func @transform_1(%arg0: i32) -> (i32, i32) {
    %c0_i32 = arith.constant 0 : i32
    %c0_i32_0 = arith.constant 0 : i32
    return %arg0, %c0_i32 : i32, i32
  }
}

</mosaic_0001>

<bundles_post_ra>
// kernel: tpu_custom_call.1
= control target key start
LH: loop header
LB: loop body
LE: loop exit
PB: predicated region body
PF: predicated region fallthrough
CT: control target
= control target key end

     0   :  { %6 = vsyncpa [#allocation3], 0  ;;  %s759_s0 = inlined_call_operand.hbm [shape: f32[16,200], index: 0, kind: input, shape index: {}]   ;;  %s760_s1 = inlined_call_operand.hbm [shape: f32[16,200], index: 1, kind: output, shape index: {}]  }
   0x1   :  { %8 = vsyncpa [#allocation3 + $0x1], 0 }
   0x2   :  { %9 = vsyncpa [#allocation4], 0 }
   0x3   :  { %11 = vsyncpa [#allocation4 + $0x1], 0  ;;  %s539_s6 = smov 0   ;;  %s541_s7 = smov 0  }
   0x4   :  { %s543_s8 = smov 0   ;;  %s545_s9 = smov 0  }
   0x5 LB: > { %s560_s10 = sadd.s32 4294967295, %s523_s9   ;;  %s351_s11 = sadd.s32 4294967294, %s523_s9   ;;  %s523_s9 = sphi %s545_s9, %s777_s9   ;;  %s519_s8 = sphi %s543_s8, %s776_s8   ;;  %s515_s7 = sphi %s541_s7, %s775_s7   ;;  %s511_s6 = sphi %s539_s6, %s774_s6  }
   0x6   : > { %s564_s12 = sadd.s32 1, %s523_s9   ;;  %s24_s13 = sadd.s32 1, %s519_s8 }
   0x7   : > { %s21_s14 = ssub.s32 %s523_s9, %s564_s12  ;;  %p31_p0 = scmp.ne.s32.totalorder %s519_s8, %s515_s7 }
   0x8   : > { %p22_p1 = scmp.eq.s32.totalorder %s21_s14, 0  ;;  %p32_p2 = scmp.eq.s32.totalorder %s523_s9, 0 }
   0x9   : > { %p37_p3 = scmp.ne.s32.totalorder %s515_s7, %s511_s6  ;;  %p38_p4 = scmp.eq.s32.totalorder %s560_s10, 0 }
   0xa   : > { %s576_s15 = scalar_select %p22_p1, %s519_s8, %s24_s13  }
   0xb   : > { %p578_p5 = por %p32_p2, %p31_p0  ;;  %p582_p6 = por %p38_p4, %p37_p3 }
   0xc   : > { %p61_p7 = scmp.eq.s32.totalorder %s560_s10, 1  ;;  %p67_p8 = scmp.eq.s32.totalorder %s351_s11, 1 }
   0xd   : > { %p389_p10 = scmp.lt.s32.totalorder %s523_s9, 2  ;;  %s87_s20 = sand.u32 1, %s519_s8  }
   0xe   : > { %p589_p11 = por %p61_p7, %p31_p0  ;;  %p593_p12 = por %p67_p8, %p37_p3 }
   0xf   : > { %s375_s21 = sshll.u32 %s523_s9, 8  ;;  %s354_s22 = sshll.u32 %s87_s20, 4 }
  0x10   : > { %s764_s18 = scalar_select %p589_p11, 1, 0 }
  0x11   : > { %s765_s19 = scalar_select %p593_p12, 1, 0 }
  0x12   : > { %s602_s25 = scalar_lea.hbm %s759_s0, %s375_s21  ;;  %s91_s26 = scalar_lea.vmem [#allocation2], %s354_s22 }
  0x13   : > { %s99_s27 = sshll.u32 %s91_s26, 4  ;;  %p606_p13 = pnand %p389_p10, %p578_p5  ;;  %s610_s27 = int_to_ptr.vmem [resolvable:$true] %s99_s27 }
  0x14   : > { %s88_s29 = scalar_lea.sflag [#allocation3], %s87_s20  ;;  %s427_s30 = scalar_lea.hbm %s602_s25, 256 }
  0x15   : > { %p428_p2 = scmp.ne.s32.totalorder %s602_s25, %s427_s30  ;;  %p429_p3 = pneg %p606_p13 }
  0x16   : > { %s432_s4 = scalar_lea.hbm %s759_s0, 512  ;;  %p433_p5 = scmp.lt.u32.totalorder %s602_s25, %s759_s0 }
  0x17   : > { %p430_p4 = pnand %p429_p3, %p428_p2  ;;  %p434_p8 = scmp.lt.u32.totalorder %s432_s4, %s427_s30 }
  0x18   : > { %p436_p9 = scmp.lt.u32.totalorder %s427_s30, %s602_s25 }
  0x19   : > { %p431_p7 = pneg %p430_p4  ;;  %p435_p10 = por %p434_p8, %p433_p5 }
  0x1b   : > { %p437_p0 = por %p436_p9, %p435_p10 }
  0x1d   : > { %p438_p1 = pnand %p437_p0, %p431_p7 }
  0x1f   : > { %441 = shalt.err (!%p438_p1)
}
  0x20   : > { %s442_s13 = scalar_lea.vmem %s610_s27, 256  ;;  %s525_s14 = smov [#allocation2]  }
  0x21   : > { %p443_p2 = scmp.ne.s32.totalorder %s610_s27, %s442_s13  ;;  %s447_s16 = sshll.u32 %s525_s14, 4  ;;  %s448_s16 = int_to_ptr.vmem [resolvable:$false] %s447_s16 }
  0x22   : > { %s449_s20 = scalar_lea.vmem %s448_s16, 512  ;;  %p450_p11 = scmp.lt.s32.totalorder %s610_s27, %s448_s16 }
  0x23   : > { %p445_p4 = pnand %p443_p2, %p429_p3  ;;  %p451_p5 = scmp.lt.s32.totalorder %s449_s20, %s442_s13 }
  0x25   : > { %p446_p12 = pneg %p445_p4  ;;  %p452_p8 = por %p451_p5, %p450_p11 }
  0x27   : > { %p453_p9 = pnand %p452_p8, %p446_p12 }
  0x29   : > { %456 = shalt.err (!%p453_p9)
}
  0x2a   : > { %384 = dma.hbm_to_vmem [thread:$0]  (!%p606_p13), %s602_s25, 256, %s610_s27, %s88_s29  }
  0x2b   : > { %p767_p0 = scmp.lt.s32.totalorder %s523_s9, 3  ;;  %p768_p1 = scmp.ge.s32.totalorder %s523_s9, 1 }
  0x2d   : > { %p105_p3 = pnand %p768_p1, %p767_p0 }
  0x2e   : > { %s644_s21 = sand.u32 (!%p105_p3), 1, %s515_s7  }
  0x2f   : > { %108 = sbr.rel (%p105_p3) target bundleno = 1128 (0x468), region = 24  ;;  %s358_s22 = sshll.u32 (!%p105_p3), %s644_s21, 4 }
  0x30   : > { %s111_s23 = scalar_lea.sflag (!%p105_p3), [#allocation3], %s644_s21  ;;  %s114_s24 = scalar_lea.vmem (!%p105_p3), [#allocation2], %s358_s22 }
  0x36   : > { %502 = dma.done.wait (%p582_p6), %s111_s23, 256  }
  0x37   : > { %504 = vsyncadd (%p582_p6), %s111_s23, 4294967040  ;;  %vm135_vm0 = vcmask 588800   ;;  %v654_v0 = vld [vmem:[%s114_s24] sm:$0xff]  ;;  %v656_v1 = vld [vmem:[%s114_s24 + $0x8] sm:$0xff]  ;;  %v526_v7 = vmov 0.0   ;;  %vm527_vm13 = vmmov 1  }
  0x38   : > { %v136_v2 = vsel %vm135_vm0, %v656_v1, -inf  ;;  %s376_s17 = sshll.u32 %s560_s10, 8  ;;  %s132_s25 = scalar_lea.vmem [#allocation5], %s358_s22 }
  0x39   : > { %v137_v3 = vmax.f32 %v654_v0, %v136_v2  ;;  %s281_s26 = sshll.u32 %s132_s25, 4  ;;  %s714_s29 = scalar_lea.hbm %s760_s1, %s376_s17  ;;  %s716_s26 = int_to_ptr.vmem [resolvable:$true] %s281_s26 }
  0x3a   : > { %s267_s10 = scalar_lea.sflag [#allocation4], %s644_s21  ;;  %s457_s30 = scalar_lea.vmem %s716_s26, 256 }
  0x3b   : > { %138 = vmax.xlane.f32.xlu0 %v137_v3  ;;  %p458_p6 = scmp.ne.s32.totalorder %s716_s26, %s457_s30  ;;  %p771_p11 = scmp.ne.s32.totalorder %s764_s18, 0 }
  0x3c   : > { %s528_s2 = smov [#allocation5]  }
  0x3d   : > { %p459_p12 = pnand %p458_p6, %p771_p11  ;;  %s461_s3 = sshll.u32 %s528_s2, 4  ;;  %s462_s3 = int_to_ptr.vmem [resolvable:$false] %s461_s3 }
  0x3e   : > { %s463_s4 = scalar_lea.vmem %s462_s3, 512  ;;  %p464_p7 = scmp.lt.s32.totalorder %s716_s26, %s462_s3 }
  0x3f   : > { %p460_p13 = pneg %p459_p12  ;;  %p465_p10 = scmp.lt.s32.totalorder %s463_s4, %s457_s30 }
  0x41   : > { %p466_p2 = por %p465_p10, %p464_p7 }
  0x43   : > { %p467_p4 = pnand %p466_p2, %p460_p13 }
  0xc8   : > { %v661_v4 = vpop.xlane.xlu0 %138 }
  0xc9   : > { %vm140_vm1 = vcmp.ge.f32.partialorder %v654_v0, %v661_v4  ;;  %vm141_vm2 = vcmp.ge.f32.partialorder %v656_v1, %v661_v4 }
  0xca   : > { %v154_v5 = vsel %vm141_vm2, -inf, %v656_v1  ;;  %v153_v6 = vsel %vm140_vm1, -inf, %v654_v0  ;;  %v360_v8 = vsel %vm140_vm1, 1.0, %v526_v7  ;;  %v361_v9 = vsel %vm141_vm2, 1.0, %v526_v7 }
  0xcb   : > { %v155_v10 = vsel %vm135_vm0, %v154_v5, -inf  ;;  %v146_v11 = vsel %vm135_vm0, %v361_v9, 0.0 }
  0xcc   : > { %v156_v12 = vmax.f32 %v153_v6, %v155_v10  ;;  %v147_v13 = vadd.f32 %v360_v8, %v146_v11 }
  0xce   : > { %157 = vmax.xlane.f32.xlu0 %v156_v12 }
 0x15b   : > { %v671_v14 = vpop.xlane.xlu0 %157 }
 0x15c   : > { %vm160_vm3 = vcmp.ge.f32.partialorder %v154_v5, %v671_v14  ;;  %vm159_vm4 = vcmp.ge.f32.partialorder %v153_v6, %v671_v14 }
 0x15d   : > { %v175_v15 = vsel %vm159_vm4, -inf, %v153_v6  ;;  %v176_v16 = vsel %vm160_vm3, -inf, %v154_v5  ;;  %v362_v17 = vsel %vm159_vm4, 1.0, %v526_v7  ;;  %v363_v18 = vsel %vm160_vm3, 1.0, %v526_v7 }
 0x15e   : > { %v177_v19 = vsel %vm135_vm0, %v176_v16, -inf  ;;  %v165_v20 = vsel %vm135_vm0, %v363_v18, 0.0 }
 0x15f   : > { %v178_v21 = vmax.f32 %v175_v15, %v177_v19  ;;  %v166_v22 = vadd.f32 %v362_v17, %v165_v20 }
 0x161   : > { %179 = vmax.xlane.f32.xlu1 %v178_v21 }
 0x1ee   : > { %v677_v23 = vpop.xlane.xlu1 %179 }
 0x1ef   : > { %vm181_vm5 = vcmp.ge.f32.partialorder %v175_v15, %v677_v23  ;;  %vm182_vm6 = vcmp.ge.f32.partialorder %v176_v16, %v677_v23 }
 0x1f0   : > { %v198_v24 = vsel %vm182_vm6, -inf, %v176_v16  ;;  %v197_v25 = vsel %vm181_vm5, -inf, %v175_v15  ;;  %v365_v28 = vsel %vm182_vm6, 1.0, %v526_v7  ;;  %v364_v29 = vsel %vm181_vm5, 1.0, %v526_v7 }
 0x1f1   : > { %v199_v26 = vsel %vm135_vm0, %v198_v24, -inf  ;;  %v187_v30 = vsel %vm135_vm0, %v365_v28, 0.0 }
 0x1f2   : > { %v200_v27 = vmax.f32 %v197_v25, %v199_v26  ;;  %v188_v31 = vadd.f32 %v364_v29, %v187_v30 }
 0x1f4   : > { %201 = vmax.xlane.f32.xlu1 %v200_v27 }
 0x1f8   : > { %148 = vadd.xlane.f32.xlu1 %v147_v13 }
 0x1fc   : > { %189 = vadd.xlane.f32.xlu1 %v188_v31 }
 0x281   : > { %v202_v32 = vpop.xlane.xlu1 %201 }
 0x282   : > { %vm203_vm7 = vcmp.ge.f32.partialorder %v197_v25, %v202_v32  ;;  %vm204_vm8 = vcmp.ge.f32.partialorder %v198_v24, %v202_v32 }
 0x283   : > { %v220_v33 = vsel %vm204_vm8, -inf, %v198_v24  ;;  %v219_v34 = vsel %vm203_vm7, -inf, %v197_v25  ;;  %v367_v37 = vsel %vm204_vm8, 1.0, %v526_v7  ;;  %v366_v38 = vsel %vm203_vm7, 1.0, %v526_v7 }
 0x284   : > { %v221_v35 = vsel %vm135_vm0, %v220_v33, -inf  ;;  %v209_v39 = vsel %vm135_vm0, %v367_v37, 0.0 }
 0x285   : > { %v222_v36 = vmax.f32 %v219_v34, %v221_v35  ;;  %v210_v40 = vadd.f32 %v366_v38, %v209_v39  ;;  %v149_v51 = vpop.xlane.xlu1 %148 }
 0x286   : > { %vm151_vm11 = vcmp.ge.f32.partialorder %v149_v51, 6.0 }
 0x287   : > { %223 = vmax.xlane.f32.xlu0 %v222_v36  ;;  %vm169_vm14 = vmxor %vm151_vm11, %vm527_vm13  ;;  %v152_v59 = vsel %vm151_vm11, %v661_v4, 0.0 }
 0x289   : > { %v190_v54 = vpop.xlane.xlu1 %189 }
 0x28b   : > { %167 = vadd.xlane.f32.xlu0 %v166_v22 }
 0x28f   : > { %211 = vadd.xlane.f32.xlu0 %v210_v40 }
 0x314   : > { %v224_v41 = vpop.xlane.xlu0 %223 }
 0x315   : > { %vm226_vm9 = vcmp.ge.f32.partialorder %v220_v33, %v224_v41  ;;  %vm225_vm10 = vcmp.ge.f32.partialorder %v219_v34, %v224_v41 }
 0x316   : > { %v241_v42 = vsel %vm225_vm10, -inf, %v219_v34  ;;  %v242_v43 = vsel %vm226_vm9, -inf, %v220_v33  ;;  %v368_v44 = vsel %vm225_vm10, 1.0, %v526_v7  ;;  %v369_v45 = vsel %vm226_vm9, 1.0, %v526_v7 }
 0x317   : > { %v243_v46 = vsel %vm135_vm0, %v242_v43, -inf  ;;  %v231_v47 = vsel %vm135_vm0, %v369_v45, 0.0 }
 0x318   : > { %v244_v48 = vmax.f32 %v241_v42, %v243_v46  ;;  %v232_v49 = vadd.f32 %v368_v44, %v231_v47  ;;  %v168_v50 = vpop.xlane.xlu0 %167 }
 0x319   : > { %v170_v52 = vadd.f32 %v168_v50, %v149_v51 }
 0x31a   : > { %245 = vmax.xlane.f32.xlu0 %v244_v48  ;;  %233 = vadd.xlane.f32.xlu1 %v232_v49 }
 0x31b   : > { %vm171_vm12 = vcmp.ge.f32.partialorder %v170_v52, 6.0  ;;  %v192_v55 = vadd.f32 %v190_v54, %v170_v52 }
 0x31c   : > { %vm689_vm15 = vmand %vm169_vm14, %vm171_vm12  ;;  %v212_v56 = vpop.xlane.xlu0 %211 }
 0x31d   : > { %vm174_vm1 = vmor %vm151_vm11, %vm689_vm15  ;;  %vm193_vm3 = vcmp.ge.f32.partialorder %v192_v55, 6.0  ;;  %v214_v57 = vadd.f32 %v212_v56, %v192_v55  ;;  %v173_v61 = vsel %vm689_vm15, %v671_v14, %v152_v59 }
 0x31e   : > { %vm191_vm2 = vmxor %vm174_vm1, %vm527_vm13 }
 0x31f   : > { %vm194_vm4 = vmand %vm191_vm2, %vm193_vm3  ;;  %vm215_vm7 = vcmp.ge.f32.partialorder %v214_v57, 6.0 }
 0x320   : > { %vm196_vm5 = vmor %vm174_vm1, %vm194_vm4  ;;  %v195_v62 = vsel %vm194_vm4, %v677_v23, %v173_v61 }
 0x321   : > { %vm213_vm6 = vmxor %vm196_vm5, %vm527_vm13 }
 0x322   : > { %vm216_vm8 = vmand %vm213_vm6, %vm215_vm7 }
 0x323   : > { %vm218_vm9 = vmor %vm196_vm5, %vm216_vm8  ;;  %v217_v63 = vsel %vm216_vm8, %v202_v32, %v195_v62 }
 0x324   : > { %vm235_vm10 = vmxor %vm218_vm9, %vm527_vm13 }
 0x3a7   : > { %v234_v58 = vpop.xlane.xlu1 %233  ;;  %v246_v2 = vpop.xlane.xlu0 %245 }
 0x3a8   : > { %v236_v60 = vadd.f32 %v234_v58, %v214_v57 }
 0x3aa   : > { %vm237_vm12 = vcmp.ge.f32.partialorder %v236_v60, 6.0 }
 0x3ab   : > { %vm238_vm14 = vmand %vm235_vm10, %vm237_vm12 }
 0x3ac   : > { %v239_v3 = vsel %vm238_vm14, %v224_v41, %v217_v63  ;;  %vm240_vm1 = vmor %vm218_vm9, %vm238_vm14 }
 0x3ad   : > { %v247_v5 = vsel %vm240_vm1, %v239_v3, %v246_v2 }
 0x3ae   : > { %v248_v6 = vadd.f32 1e-07, %v247_v5 }
 0x3b0   : > { %v249_v4 = vsub.f32 %v654_v0, %v248_v6  ;;  %v250_v7 = vsub.f32 %v656_v1, %v248_v6 }
 0x3b2   : > { %v251_v8 = vmax.f32 %v249_v4, 0.0  ;;  %v252_v9 = vmax.f32 %v250_v7, 0.0 }
 0x3b4   : > { %v253_v10 = vsel %vm135_vm0, %v252_v9, 0.0 }
 0x3b5   : > { %v254_v11 = vadd.f32 %v253_v10, %v251_v8 }
 0x3b7   : > { %255 = vadd.xlane.f32.xlu1 %v254_v11 }
 0x444   : > { %v256_v12 = vpop.xlane.xlu1 %255 }
 0x445   : > { %v257_v13 = vadd.f32 1e-07, %v256_v12 }
 0x447   : > { %425 = vrcp.f32 %v257_v13 }
 0x451   : > { %v426_v14 = vpop.eup %425 }
 0x452   : > { %v259_v15 = vmul.f32 %v426_v14, %v257_v13 }
 0x454   : > { %v260_v16 = vsub.f32 2.0, %v259_v15 }
 0x456   : > { %v261_v0 = vmul.f32 %v426_v14, %v260_v16 }
 0x458   : > { %v262_v1 = vmul.f32 %v261_v0, %v251_v8  ;;  %v263_v17 = vmul.f32 %v261_v0, %v252_v9 }
 0x45a   : > { %264 = vst [vmem:[%s132_s25] sm:$0xff] %v262_v1  ;;  %265 = vst.msk [vmem:[%s132_s25 + $0x8] sm:$0xff] %vm135_vm0, %v263_v17 }
 0x45b   : > { %470 = shalt.err (!%p467_p4)
}
 0x45c   : > { %s471_s5 = scalar_lea.hbm %s714_s29, 256  ;;  %s475_s14 = scalar_lea.hbm %s760_s1, 512 }
 0x45d   : > { %p472_p5 = scmp.ne.s32.totalorder %s714_s29, %s471_s5  ;;  %p476_p0 = scmp.lt.u32.totalorder %s714_s29, %s760_s1 }
 0x45e   : > { %p477_p1 = scmp.lt.u32.totalorder %s475_s14, %s471_s5  ;;  %p479_p6 = scmp.lt.u32.totalorder %s471_s5, %s714_s29 }
 0x45f   : > { %p473_p8 = pnand %p472_p5, %p771_p11 }
 0x460   : > { %p478_p3 = por %p477_p1, %p476_p0 }
 0x461   : > { %p474_p9 = pneg %p473_p8 }
 0x462   : > { %p480_p12 = por %p479_p6, %p478_p3 }
 0x464   : > { %p481_p13 = pnand %p480_p12, %p474_p9 }
 0x466   : > { %484 = shalt.err (!%p481_p13)
}
 0x467   : > { %379 = dma.vmem_to_hbm [thread:$0]  (%p771_p11), %s716_s26, 256, %s714_s29, %s267_s10  }
 0x468 PF: > { %s293_s21 = sand.u32 1, %s511_s6   ;;  %p772_p7 = scmp.ne.s32.totalorder %s765_s19, 0 }
 0x469   : > { %p773_p10 = scmp.ge.s32.totalorder %s523_s9, 2  ;;  %s294_s22 = scalar_lea.sflag [#allocation4], %s293_s21 }
 0x46b   : > { %p386_p2 = pnand %p773_p10, %p772_p7 }
 0x46d   : > { %506 = dma.done.wait (!%p386_p2), %s294_s22, 256  }
 0x46e   : > { %508 = vsyncadd (!%p386_p2), %s294_s22, 4294967040  ;;  %p14_p4 = scmp.ge.s32.totalorder %s564_s12, 4   ;;  %s774_s6 = smov %s515_s7 }
 0x46f   : > { %s775_s7 = smov %s519_s8  ;;  %s776_s8 = smov %s576_s15 }
 0x470   : > { %s777_s9 = smov %s564_s12  ;;  %16 = sbr.rel (!%p14_p4) target bundleno = 5 (0x5), region = 69 }
 0x477   :  { %299 = vsyncpa [#allocation3], 1 }
 0x478   :  { %301 = vsyncpa [#allocation3 + $0x1], 1 }
 0x479   :  { %302 = vsyncpa [#allocation4], 1 }
 0x47a   :  { %304 = vsyncpa [#allocation4 + $0x1], 1 }

</bundles_post_ra>
